<compile_context>
chip_gen: v5e
topology: v5e:2x2
jax: 0.10.0
libtpu: 0.0.40
codegen_flags: <defaults>
</compile_context>

<pallas_src>
import jax
import jax.numpy as jnp
from jax.experimental import pallas as pl
from jax.experimental.pallas import tpu as pltpu


def _cdiv(a, b):
    return -(-a // b)


def _round_up(x, m):
    return _cdiv(x, m) * m


# -----------------------------------------------------------------------------
# Kernel: one fused pass over a (TB, feat) batch tile.  Weights are bf16 (MXU
# native); biases and all post-matmul elementwise math are f32.
# -----------------------------------------------------------------------------
def sefusion_kernel(x_ref,
                    w1_ref, b1_ref,
                    wg_ref, bg_ref,
                    wg2_ref, bg2_ref,
                    wo_ref, bo_ref,
                    out_ref):
    # activation = BN1(Linear1(concat(x)))  — BN1 folded into w1/b1 host-side,
    # dropout is identity in eval mode.
    a = jnp.dot(x_ref[...], w1_ref[...], preferred_element_type=jnp.float32)
    a = a + b1_ref[...]                                     # f32 (TB, H)

    # gates = relu(gating_bn(gating_linear(a)))   (BN folded into wg/bg)
    g = jnp.dot(a.astype(jnp.bfloat16), wg_ref[...],
                preferred_element_type=jnp.float32)
    g = jnp.maximum(g + bg_ref[...], 0.0)

    # gates = sigmoid(gating_linear2(gates))      (gating_last_bn=False)
    g = jnp.dot(g.astype(jnp.bfloat16), wg2_ref[...],
                preferred_element_type=jnp.float32)
    g = g + bg2_ref[...]
    g = 0.5 * jnp.tanh(0.5 * g) + 0.5               # sigmoid via one EUP tanh

    # elementwise gate, then output projection (N padded to lane-dense 128)
    a = a * g
    out = jnp.dot(a.astype(jnp.bfloat16), wo_ref[...],
                  preferred_element_type=jnp.float32)
    out_ref[...] = (out + bo_ref[...]).astype(out_ref.dtype)   # bf16 writeback


# -----------------------------------------------------------------------------
# Host-side parameter prep: fold BN into the adjacent Linear, pad out_proj to a
# 128-lane multiple, cast MXU operands to bf16.
# -----------------------------------------------------------------------------
def fold_bn(gamma, beta, mean, var, eps=1e-5):
    scale = gamma / jnp.sqrt(var + eps)
    shift = beta - mean * scale
    return scale, shift


def prepare_params(raw, lane=128):
    s1, t1 = fold_bn(raw["gamma1"], raw["beta1"], raw["mean1"], raw["var1"])
    w1 = raw["w1"] * s1[None, :]
    b1 = raw["b1"] * s1 + t1

    sg, tg = fold_bn(raw["gammag"], raw["betag"], raw["meang"], raw["varg"])
    wg = raw["wg"] * sg[None, :]
    bg = raw["bg"] * sg + tg

    c = raw["wo"].shape[1]
    c_pad = _round_up(c, lane)
    wo = jnp.pad(raw["wo"], ((0, 0), (0, c_pad - c)))
    bo = jnp.pad(raw["bo"], (0, c_pad - c))

    # TODO(synk): gating_last_bn=True path (extra BN before the sigmoid) is not
    # folded here; the module default is False.
    return dict(
        w1=w1.astype(jnp.bfloat16),
        b1=b1[None, :].astype(jnp.float32),
        wg=wg.astype(jnp.bfloat16),
        bg=bg[None, :].astype(jnp.float32),
        wg2=raw["wg2"].astype(jnp.bfloat16),
        bg2=raw["bg2"][None, :].astype(jnp.float32),
        wo=wo.astype(jnp.bfloat16),
        bo=bo[None, :].astype(jnp.float32),
        num_classes=c,
    )


# -----------------------------------------------------------------------------
# Tile selection: balance the last tile, round to 16 sublanes (bf16 packing),
# and guarantee >=2 grid steps when B >= 32 so ("parallel",) can use both v7x
# TensorCores.
# -----------------------------------------------------------------------------
def _pick_tile(B, block_b):
    n_steps = _cdiv(B, block_b)
    if B >= 32:
        n_steps = max(n_steps, 2)
    tb = _round_up(_cdiv(B, n_steps), 16)
    b_pad = _round_up(B, tb)
    return tb, b_pad


# -----------------------------------------------------------------------------
# Wrapper: 1-D batch grid (tb rows / step); weights VMEM-resident via constant
# index maps; batch axis marked "parallel".
# -----------------------------------------------------------------------------
def sefusion_forward(x1, x2, pp, block_b=2048):
    B = x1.shape[0]
    feat = x1.shape[1] + x2.shape[1]
    H = pp["w1"].shape[1]
    HR = pp["wg"].shape[1]
    CP = pp["wo"].shape[1]
    C = pp["num_classes"]

    tb, b_pad = _pick_tile(B, block_b)

    # cast -> concat -> pad (cast first so the pad copy is half-width)
    x = jnp.concatenate([x1.astype(jnp.bfloat16), x2.astype(jnp.bfloat16)],
                        axis=1)
    x = jnp.pad(x, ((0, b_pad - B), (0, 0)))

    def row_spec(n):
        return pl.BlockSpec((tb, n), lambda i: (i, 0))

    def const_spec(shape):
        return pl.BlockSpec(shape, lambda i: (0, 0))

    in_specs = [
        row_spec(feat),
        const_spec((feat, H)), const_spec((1, H)),
        const_spec((H, HR)), const_spec((1, HR)),
        const_spec((HR, H)), const_spec((1, H)),
        const_spec((H, CP)), const_spec((1, CP)),
    ]
    out_spec = pl.BlockSpec((tb, CP), lambda i: (i, 0))

    args = (x,
            pp["w1"], pp["b1"],
            pp["wg"], pp["bg"],
            pp["wg2"], pp["bg2"],
            pp["wo"], pp["bo"])

    flops = 2 * b_pad * (feat * H + H * HR + HR * H + H * CP)
    bytes_accessed = sum(int(a.size) * a.dtype.itemsize for a in args) \
        + b_pad * CP * 2
    cost = pl.CostEstimate(flops=flops,
                           transcendentals=b_pad * H,
                           bytes_accessed=bytes_accessed)

    out = pl.pallas_call(
        sefusion_kernel,
        out_shape=jax.ShapeDtypeStruct((b_pad, CP), jnp.bfloat16),
        grid=(b_pad // tb,),
        in_specs=in_specs,
        out_specs=out_spec,
        compiler_params=pltpu.CompilerParams(
            dimension_semantics=("parallel",)),
        cost_estimate=cost,
    )(*args)
    return out[:B, :C].astype(jnp.float32)


# -----------------------------------------------------------------------------
# Deterministic parameter construction + references
# -----------------------------------------------------------------------------
def make_raw_params(key, f1, f2, hidden, reduction, num_classes):
    hr = hidden // reduction
    feat = f1 + f2
    ks = jax.random.split(key, 6)

    def lin(k, fan_in, fan_out):
        lim = 1.0 / jnp.sqrt(fan_in)
        kw, kb = jax.random.split(k)
        w = jax.random.uniform(kw, (fan_in, fan_out), jnp.float32, -lim, lim)
        b = jax.random.uniform(kb, (fan_out,), jnp.float32, -lim, lim)
        return w, b

    w1, b1 = lin(ks[0], feat, hidden)
    wg, bg = lin(ks[1], hidden, hr)
    wg2, bg2 = lin(ks[2], hr, hidden)
    wo, bo = lin(ks[3], hidden, num_classes)

    def bn(k, n):
        kg, kb, km, kv = jax.random.split(k, 4)
        return (1.0 + 0.1 * jax.random.normal(kg, (n,), jnp.float32),
                0.1 * jax.random.normal(kb, (n,), jnp.float32),
                0.1 * jax.random.normal(km, (n,), jnp.float32),
                1.0 + 0.1 * jax.random.uniform(kv, (n,), jnp.float32))

    g1, be1, m1, v1 = bn(ks[4], hidden)
    gg, beg, mg, vg = bn(ks[5], hr)

    return dict(w1=w1, b1=b1, wg=wg, bg=bg, wg2=wg2, bg2=bg2, wo=wo, bo=bo,
                gamma1=g1, beta1=be1, mean1=m1, var1=v1,
                gammag=gg, betag=beg, meang=mg, varg=vg)


def reference_f32(x1, x2, raw):
    """Straight transcription of the PyTorch module (eval mode) in f32."""
    x = jnp.concatenate([x1, x2], axis=1)
    s1, t1 = fold_bn(raw["gamma1"], raw["beta1"], raw["mean1"], raw["var1"])
    sg, tg = fold_bn(raw["gammag"], raw["betag"], raw["meang"], raw["varg"])
    a = x @ raw["w1"] + raw["b1"]
    a = a * s1 + t1
    g = a @ raw["wg"] + raw["bg"]
    g = jnp.maximum(g * sg + tg, 0.0)
    g = g @ raw["wg2"] + raw["bg2"]
    g = jax.nn.sigmoid(g)
    a = a * g
    return a @ raw["wo"] + raw["bo"]


def reference_bf16(x1, x2, pp):
    """Mirror of the kernel's mixed-precision path (tight tolerance check)."""
    xb = jnp.concatenate([x1.astype(jnp.bfloat16),
                          x2.astype(jnp.bfloat16)], axis=1)
    a = jnp.dot(xb, pp["w1"], preferred_element_type=jnp.float32) + pp["b1"]
    g = jnp.dot(a.astype(jnp.bfloat16), pp["wg"],
                preferred_element_type=jnp.float32) + pp["bg"]
    g = jnp.maximum(g, 0.0)
    g = jnp.dot(g.astype(jnp.bfloat16), pp["wg2"],
                preferred_element_type=jnp.float32) + pp["bg2"]
    g = jax.nn.sigmoid(g)
    a = a * g
    out = jnp.dot(a.astype(jnp.bfloat16), pp["wo"],
                  preferred_element_type=jnp.float32) + pp["bo"]
    out = out.astype(jnp.bfloat16).astype(jnp.float32)   # kernel writes bf16
    return out[:, :pp["num_classes"]]


if __name__ == "__main__":
    # Small shapes consistent with the module's forward: two feature tensors
    # concatenated -> feat_dim = 32 + 32 = 64; hidden=256, reduction=8, C=82.
    F1 = F2 = 32
    hidden = 256
    reduction = 8
    num_classes = 82

    key = jax.random.PRNGKey(0)
    k1, k2, kp, k3, k4 = jax.random.split(key, 5)
    raw = make_raw_params(kp, F1, F2, hidden, reduction, num_classes)
    pp = prepare_params(raw)

    # --- test 1: tiny batch (single grid step) ------------------------------
    B = 8
    x1 = jax.random.normal(k1, (B, F1), jnp.float32)
    x2 = jax.random.normal(k2, (B, F2), jnp.float32)

    out = jax.block_until_ready(sefusion_forward(x1, x2, pp))
    assert out.shape == (B, num_classes), out.shape

    ref16 = reference_bf16(x1, x2, pp)
    assert jnp.allclose(out, ref16, atol=2e-2, rtol=2e-2), \
        float(jnp.max(jnp.abs(out - ref16)))

    ref32 = reference_f32(x1, x2, raw)
    assert jnp.allclose(out, ref32, atol=1e-1, rtol=1e-1), \
        float(jnp.max(jnp.abs(out - ref32)))

    # --- test 2: batch large enough to exercise the >=2-step grid path ------
    B2 = 400
    x1b = jax.random.normal(k3, (B2, F1), jnp.float32)
    x2b = jax.random.normal(k4, (B2, F2), jnp.float32)

    out2 = jax.block_until_ready(sefusion_forward(x1b, x2b, pp))
    assert out2.shape == (B2, num_classes), out2.shape

    ref16b = reference_bf16(x1b, x2b, pp)
    assert jnp.allclose(out2, ref16b, atol=2e-2, rtol=2e-2), \
        float(jnp.max(jnp.abs(out2 - ref16b)))

    print("KERNEL_OK")
</pallas_src>

<mosaic_0001>
module attributes {stable_mosaic.version = 11 : i64} {
  func.func @sefusion_kernel(%arg0: i32, %arg1: memref<16x64xbf16, #tpu.memory_space<vmem>>, %arg2: memref<64x256xbf16, #tpu.memory_space<vmem>>, %arg3: memref<1x256xf32, #tpu.memory_space<vmem>>, %arg4: memref<256x32xbf16, #tpu.memory_space<vmem>>, %arg5: memref<1x32xf32, #tpu.memory_space<vmem>>, %arg6: memref<32x256xbf16, #tpu.memory_space<vmem>>, %arg7: memref<1x256xf32, #tpu.memory_space<vmem>>, %arg8: memref<256x128xbf16, #tpu.memory_space<vmem>>, %arg9: memref<1x128xf32, #tpu.memory_space<vmem>>, %arg10: memref<16x128xbf16, #tpu.memory_space<vmem>>) attributes {dimension_semantics = [#tpu.dimension_semantics<parallel>], iteration_bounds = array<i64: 1>, scalar_prefetch = 0 : i64, scratch_operands = 0 : i64, tpu.core_type = #tpu.core_type<tc>, window_params = [{transform_indices = @transform_0, window_bounds = array<i64: 16, 64>}, {pipeline_mode = #tpu.pipeline_mode<synchronous>, transform_indices = @transform_1, window_bounds = array<i64: 64, 256>}, {pipeline_mode = #tpu.pipeline_mode<synchronous>, transform_indices = @transform_2, window_bounds = array<i64: 1, 256>}, {pipeline_mode = #tpu.pipeline_mode<synchronous>, transform_indices = @transform_3, window_bounds = array<i64: 256, 32>}, {pipeline_mode = #tpu.pipeline_mode<synchronous>, transform_indices = @transform_4, window_bounds = array<i64: 1, 32>}, {pipeline_mode = #tpu.pipeline_mode<synchronous>, transform_indices = @transform_5, window_bounds = array<i64: 32, 256>}, {pipeline_mode = #tpu.pipeline_mode<synchronous>, transform_indices = @transform_6, window_bounds = array<i64: 1, 256>}, {pipeline_mode = #tpu.pipeline_mode<synchronous>, transform_indices = @transform_7, window_bounds = array<i64: 256, 128>}, {pipeline_mode = #tpu.pipeline_mode<synchronous>, transform_indices = @transform_8, window_bounds = array<i64: 1, 128>}, {transform_indices = @transform_9, window_bounds = array<i64: 16, 128>}]} {
    %c0 = arith.constant 0 : index
    %c0_0 = arith.constant 0 : index
    %0 = vector.load %arg1[%c0, %c0_0] : memref<16x64xbf16, #tpu.memory_space<vmem>>, vector<16x64xbf16>
    %c0_1 = arith.constant 0 : index
    %c0_2 = arith.constant 0 : index
    %1 = vector.load %arg2[%c0_1, %c0_2] : memref<64x256xbf16, #tpu.memory_space<vmem>>, vector<64x256xbf16>
    %cst = arith.constant dense<0.000000e+00> : vector<16x256xf32>
    %2 = tpu.matmul %0, %1, %cst {dimension_numbers = #tpu.dot_dimension_numbers<[1], [0], [0], [1], [0, 0, 1, 1], [], []>} : vector<16x64xbf16>, vector<64x256xbf16>, vector<16x256xf32> -> vector<16x256xf32>
    %c0_3 = arith.constant 0 : index
    %c0_4 = arith.constant 0 : index
    %3 = vector.load %arg3[%c0_3, %c0_4] : memref<1x256xf32, #tpu.memory_space<vmem>>, vector<1x256xf32>
    %4 = vector.broadcast %3 : vector<1x256xf32> to vector<16x256xf32>
    %5 = arith.addf %2, %4 : vector<16x256xf32>
    %6 = arith.truncf %5 : vector<16x256xf32> to vector<16x256xbf16>
    %c0_5 = arith.constant 0 : index
    %c0_6 = arith.constant 0 : index
    %7 = vector.load %arg4[%c0_5, %c0_6] : memref<256x32xbf16, #tpu.memory_space<vmem>>, vector<256x32xbf16>
    %cst_7 = arith.constant dense<0.000000e+00> : vector<16x32xf32>
    %8 = tpu.matmul %6, %7, %cst_7 {dimension_numbers = #tpu.dot_dimension_numbers<[1], [0], [0], [1], [0, 0, 1, 1], [], []>} : vector<16x256xbf16>, vector<256x32xbf16>, vector<16x32xf32> -> vector<16x32xf32>
    %c0_8 = arith.constant 0 : index
    %c0_9 = arith.constant 0 : index
    %9 = vector.load %arg5[%c0_8, %c0_9] : memref<1x32xf32, #tpu.memory_space<vmem>>, vector<1x32xf32>
    %10 = vector.broadcast %9 : vector<1x32xf32> to vector<16x32xf32>
    %11 = arith.addf %8, %10 : vector<16x32xf32>
    %cst_10 = arith.constant 0.000000e+00 : f32
    %12 = vector.broadcast %cst_10 : f32 to vector<16x32xf32>
    %13 = arith.maximumf %11, %12 : vector<16x32xf32>
    %14 = arith.truncf %13 : vector<16x32xf32> to vector<16x32xbf16>
    %c0_11 = arith.constant 0 : index
    %c0_12 = arith.constant 0 : index
    %15 = vector.load %arg6[%c0_11, %c0_12] : memref<32x256xbf16, #tpu.memory_space<vmem>>, vector<32x256xbf16>
    %cst_13 = arith.constant dense<0.000000e+00> : vector<16x256xf32>
    %16 = tpu.matmul %14, %15, %cst_13 {dimension_numbers = #tpu.dot_dimension_numbers<[1], [0], [0], [1], [0, 0, 1, 1], [], []>} : vector<16x32xbf16>, vector<32x256xbf16>, vector<16x256xf32> -> vector<16x256xf32>
    %c0_14 = arith.constant 0 : index
    %c0_15 = arith.constant 0 : index
    %17 = vector.load %arg7[%c0_14, %c0_15] : memref<1x256xf32, #tpu.memory_space<vmem>>, vector<1x256xf32>
    %18 = vector.broadcast %17 : vector<1x256xf32> to vector<16x256xf32>
    %19 = arith.addf %16, %18 : vector<16x256xf32>
    %cst_16 = arith.constant 5.000000e-01 : f32
    %20 = vector.broadcast %cst_16 : f32 to vector<16x256xf32>
    %21 = arith.mulf %20, %19 : vector<16x256xf32>
    %22 = math.tanh %21 : vector<16x256xf32>
    %cst_17 = arith.constant 5.000000e-01 : f32
    %23 = vector.broadcast %cst_17 : f32 to vector<16x256xf32>
    %24 = arith.mulf %23, %22 : vector<16x256xf32>
    %cst_18 = arith.constant 5.000000e-01 : f32
    %25 = vector.broadcast %cst_18 : f32 to vector<16x256xf32>
    %26 = arith.addf %24, %25 : vector<16x256xf32>
    %27 = arith.mulf %5, %26 : vector<16x256xf32>
    %28 = arith.truncf %27 : vector<16x256xf32> to vector<16x256xbf16>
    %c0_19 = arith.constant 0 : index
    %c0_20 = arith.constant 0 : index
    %29 = vector.load %arg8[%c0_19, %c0_20] : memref<256x128xbf16, #tpu.memory_space<vmem>>, vector<256x128xbf16>
    %cst_21 = arith.constant dense<0.000000e+00> : vector<16x128xf32>
    %30 = tpu.matmul %28, %29, %cst_21 {dimension_numbers = #tpu.dot_dimension_numbers<[1], [0], [0], [1], [0, 0, 1, 1], [], []>} : vector<16x256xbf16>, vector<256x128xbf16>, vector<16x128xf32> -> vector<16x128xf32>
    %c0_22 = arith.constant 0 : index
    %c0_23 = arith.constant 0 : index
    %31 = vector.load %arg9[%c0_22, %c0_23] : memref<1x128xf32, #tpu.memory_space<vmem>>, vector<1x128xf32>
    %32 = vector.broadcast %31 : vector<1x128xf32> to vector<16x128xf32>
    %33 = arith.addf %30, %32 : vector<16x128xf32>
    %34 = arith.truncf %33 : vector<16x128xf32> to vector<16x128xbf16>
    %c0_24 = arith.constant 0 : index
    %c0_25 = arith.constant 0 : index
    %35 = vector.load %arg10[%c0_24, %c0_25] : memref<16x128xbf16, #tpu.memory_space<vmem>>, vector<16x128xbf16>
    tpu.vector_store %arg10[%c0_24, %c0_25], %34 {strides = array<i32>} : memref<16x128xbf16, #tpu.memory_space<vmem>>, vector<16x128xbf16>,
    return
  }
  func.func @transform_0(%arg0: i32) -> (i32, i32) {
    %c0_i32 = arith.constant 0 : i32
    %c0_i32_0 = arith.constant 0 : i32
    return %arg0, %c0_i32 : i32, i32
  }
  func.func @transform_1(%arg0: i32) -> (i32, i32) {
    %c0_i32 = arith.constant 0 : i32
    %c0_i32_0 = arith.constant 0 : i32
    %c0_i32_1 = arith.constant 0 : i32
    return %c0_i32, %c0_i32_0 : i32, i32
  }
  func.func @transform_2(%arg0: i32) -> (i32, i32) {
    %c0_i32 = arith.constant 0 : i32
    %c0_i32_0 = arith.constant 0 : i32
    %c0_i32_1 = arith.constant 0 : i32
    return %c0_i32, %c0_i32_0 : i32, i32
  }
  func.func @transform_3(%arg0: i32) -> (i32, i32) {
    %c0_i32 = arith.constant 0 : i32
    %c0_i32_0 = arith.constant 0 : i32
    %c0_i32_1 = arith.constant 0 : i32
    return %c0_i32, %c0_i32_0 : i32, i32
  }
  func.func @transform_4(%arg0: i32) -> (i32, i32) {
    %c0_i32 = arith.constant 0 : i32
    %c0_i32_0 = arith.constant 0 : i32
    %c0_i32_1 = arith.constant 0 : i32
    return %c0_i32, %c0_i32_0 : i32, i32
  }
  func.func @transform_5(%arg0: i32) -> (i32, i32) {
    %c0_i32 = arith.constant 0 : i32
    %c0_i32_0 = arith.constant 0 : i32
    %c0_i32_1 = arith.constant 0 : i32
    return %c0_i32, %c0_i32_0 : i32, i32
  }
  func.func @transform_6(%arg0: i32) -> (i32, i32) {
    %c0_i32 = arith.constant 0 : i32
    %c0_i32_0 = arith.constant 0 : i32
    %c0_i32_1 = arith.constant 0 : i32
    return %c0_i32, %c0_i32_0 : i32, i32
  }
  func.func @transform_7(%arg0: i32) -> (i32, i32) {
    %c0_i32 = arith.constant 0 : i32
    %c0_i32_0 = arith.constant 0 : i32
    %c0_i32_1 = arith.constant 0 : i32
    return %c0_i32, %c0_i32_0 : i32, i32
  }
  func.func @transform_8(%arg0: i32) -> (i32, i32) {
    %c0_i32 = arith.constant 0 : i32
    %c0_i32_0 = arith.constant 0 : i32
    %c0_i32_1 = arith.constant 0 : i32
    return %c0_i32, %c0_i32_0 : i32, i32
  }
  func.func @transform_9(%arg0: i32) -> (i32, i32) {
    %c0_i32 = arith.constant 0 : i32
    %c0_i32_0 = arith.constant 0 : i32
    return %arg0, %c0_i32 : i32, i32
  }
}

</mosaic_0001>

<bundles_post_ra>
// kernel: tpu_custom_call.1
= control target key start
LH: loop header
LB: loop body
LE: loop exit
PB: predicated region body
PF: predicated region fallthrough
CT: control target
= control target key end

     0   :  { %14 = vsyncpa [#allocation3], 0  ;;  %s1141_s0 = inlined_call_operand.hbm [shape: bf16[16,64], index: 0, kind: input, shape index: {}]   ;;  %s1142_s1 = inlined_call_operand.hbm [shape: bf16[64,256], index: 1, kind: input, shape index: {}]   ;;  %s1143_s2 = inlined_call_operand.vmem [shape: f32[1,256], index: 2, kind: input, shape index: {}]   ;;  %s1144_s3 = inlined_call_operand.vmem [shape: bf16[256,32], index: 3, kind: input, shape index: {}]   ;;  %s1145_s4 = inlined_call_operand.vmem [shape: f32[1,32], index: 4, kind: input, shape index: {}]   ;;  %s1146_s5 = inlined_call_operand.vmem [shape: bf16[32,256], index: 5, kind: input, shape index: {}]   ;;  %s1147_s6 = inlined_call_operand.vmem [shape: f32[1,256], index: 6, kind: input, shape index: {}]   ;;  %s1148_s7 = inlined_call_operand.vmem [shape: bf16[256,128], index: 7, kind: input, shape index: {}]   ;;  %s1149_s8 = inlined_call_operand.vmem [shape: f32[1,128], index: 8, kind: input, shape index: {}]   ;;  %s1150_s9 = inlined_call_operand.hbm [shape: bf16[16,128], index: 9, kind: output, shape index: {}]  }
   0x1   :  { %15 = vsyncpa [#allocation6], 0 }
   0x2   :  { %16 = vsyncpa [#allocation4], 0  ;;  %s21_s11 = sshll.u32 %s1141_s0, 4  ;;  %s921_s12 = smov [#allocation2]   ;;  %s22_s11 = int_to_ptr.hbm [resolvable:$true] %s21_s11 }
   0x3   :  { %s23_s13 = sshll.u32 %s921_s12, 4  ;;  %s34_s16 = sshll.u32 %s1142_s1, 4  ;;  %s24_s13 = int_to_ptr.vmem [resolvable:$true] %s23_s13  ;;  %s35_s16 = int_to_ptr.hbm [resolvable:$true] %s34_s16 }
   0x4   :  { %s922_s17 = smov 64   ;;  %s923_s18 = smov 4  }
   0x5   :  { %29 = dma.hbm_to_vmem [thread:$0]  %s22_s11, 128, %s24_s13, [#allocation3], %s922_s17, %s922_s17, %s923_s18  }
   0x6   :  { %s924_s19 = smov [#allocation5]   ;;  %s925_s21 = smov 128  }
   0x7   :  { %s36_s20 = sshll.u32 %s924_s19, 4  ;;  %s926_s0 = smov 8   ;;  %s37_s20 = int_to_ptr.vmem [resolvable:$true] %s36_s20 }
   0x8   :  { %42 = dma.hbm_to_vmem [thread:$0]  %s35_s16, 1024, %s37_s20, [#allocation6], %s925_s21, %s925_s21, %s926_s0  }
   0x9   :  { %915 = dma.done.wait [#allocation3], 128  }
   0xa   :  { %916 = vsyncadd [#allocation3], 4294967168 }
   0xb   :  { %917 = dma.done.wait [#allocation6], 1024  }
   0xc   :  { %918 = vsyncadd [#allocation6], 4294966272  ;;  %v622_v0 = vld [vmem:[#allocation5 + $0x30] sm:$0xf]  ;;  %v784_v1 = vld [vmem:[#allocation5 + $0x34] sm:$0xf0] }
   0xd   :  { %v783_v2 = vld [vmem:[#allocation5 + $0x34] sm:$0xf]  ;;  %v623_v3 = vor.u32 %v784_v1, %v622_v0  ;;  %v624_v4 = vld [vmem:[#allocation5 + $0x38] sm:$0xf0]  ;;  %v614_v5 = vld [vmem:[#allocation5 + $0x20] sm:$0xf] }
   0xe   :  { %v782_v6 = vld [vmem:[#allocation5 + $0x24] sm:$0xf0]  ;;  %v627_v7 = vor.u32 %v783_v2, %v624_v4  ;;  %v781_v8 = vld [vmem:[#allocation5 + $0x24] sm:$0xf]  ;;  %v616_v9 = vld [vmem:[#allocation5 + $0x28] sm:$0xf0] }
   0xf   :  { %135 = vmatpush.bf16.msra.mxu2 %v623_v3  ;;  %v615_v10 = vor.u32 %v782_v6, %v614_v5  ;;  %v619_v11 = vor.u32 %v781_v8, %v616_v9  ;;  %v606_v12 = vld [vmem:[#allocation5 + $0x10] sm:$0xf]  ;;  %v780_v13 = vld [vmem:[#allocation5 + $0x14] sm:$0xf0]  ;;  %v779_v14 = vld [vmem:[#allocation5 + $0x14] sm:$0xf] }
  0x10   :  { %149 = vmatpush.bf16.msra.mxu3 %v627_v7  ;;  %v608_v15 = vld [vmem:[#allocation5 + $0x18] sm:$0xf0]  ;;  %v607_v16 = vor.u32 %v780_v13, %v606_v12  ;;  %v598_v18 = vld [vmem:[#allocation5] sm:$0xf]  ;;  %v778_v19 = vld [vmem:[#allocation5 + $0x4] sm:$0xf0] }
  0x11   :  { %v611_v17 = vor.u32 %v779_v14, %v608_v15  ;;  %v777_v20 = vld [vmem:[#allocation5 + $0x4] sm:$0xf]  ;;  %v600_v21 = vld [vmem:[#allocation5 + $0x8] sm:$0xf0]  ;;  %v599_v22 = vor.u32 %v778_v19, %v598_v18  ;;  %v792_v24 = vld [vmem:[%s1144_s3 + $0x38] sm:$0xff]  ;;  %vm127_vm0 = vcmask 523264  }
  0x12   :  { %v603_v23 = vor.u32 %v777_v20, %v600_v21  ;;  %v800_v25 = vld [vmem:[%s1144_s3 + $0x78] sm:$0xff]  ;;  %v776_v26 = vld [vmem:[#allocation2] sm:$0xff]  ;;  %v791_v27 = vld [vmem:[%s1144_s3 + $0x30] sm:$0xff]  ;;  %vm354_vm1 = vcmask 261120   ;;  %s927_s13 = smov [#allocation7]   ;;  %s578_s19 = sshll.u32 %s1150_s9, 4  ;;  %s579_s19 = int_to_ptr.hbm [resolvable:$true] %s578_s19 }
  0x13   :  { %136 = vmatpush.bf16.msra.mxu2 %v615_v10  ;;  %v799_v28 = vld [vmem:[%s1144_s3 + $0x70] sm:$0xff]  ;;  %v790_v29 = vld [vmem:[%s1144_s3 + $0x28] sm:$0xff]  ;;  %v789_v31 = vld [vmem:[%s1144_s3 + $0x20] sm:$0xff]  ;;  %s576_s14 = sshll.u32 %s927_s13, 4  ;;  %s577_s14 = int_to_ptr.vmem [resolvable:$true] %s576_s14 }
  0x14   :  { %150 = vmatpush.bf16.msra.mxu3 %v619_v11  ;;  %v798_v30 = vld [vmem:[%s1144_s3 + $0x68] sm:$0xff]  ;;  %v797_v32 = vld [vmem:[%s1144_s3 + $0x60] sm:$0xff]  ;;  %v788_v33 = vld [vmem:[%s1144_s3 + $0x18] sm:$0xff] }
  0x15   :  { %v796_v34 = vld [vmem:[%s1144_s3 + $0x58] sm:$0xff]  ;;  %v787_v35 = vld [vmem:[%s1144_s3 + $0x10] sm:$0xff]  ;;  %v786_v37 = vld [vmem:[%s1144_s3 + $0x8] sm:$0xff] }
  0x16   :  { %v795_v36 = vld [vmem:[%s1144_s3 + $0x50] sm:$0xff]  ;;  %v794_v38 = vld [vmem:[%s1144_s3 + $0x48] sm:$0xff]  ;;  %v785_v39 = vld [vmem:[%s1144_s3] sm:$0xff] }
  0x17   :  { %137 = vmatpush.bf16.msra.mxu2 %v607_v16  ;;  %v793_v40 = vld [vmem:[%s1144_s3 + $0x40] sm:$0xff]  ;;  %v704_v54 = vld [vmem:[%s1146_s5 + $0x10] sm:$0xf]  ;;  %v804_v55 = vld [vmem:[%s1146_s5 + $0x14] sm:$0xf0] }
  0x18   :  { %151 = vmatpush.bf16.msra.mxu3 %v611_v17  ;;  %v76_v43 = vld [vmem:[%s1143_s2] sm:$0x3]  ;;  %v803_v56 = vld [vmem:[%s1146_s5 + $0x14] sm:$0xf]  ;;  %v705_v57 = vor.u32 %v804_v55, %v704_v54  ;;  %v706_v58 = vld [vmem:[%s1146_s5 + $0x18] sm:$0xf0] }
  0x19   :  { %v78_v44 = vperm.slane %v76_v43, 0  ;;  %v79_v45 = vperm.slane %v76_v43, 1  ;;  %v709_v59 = vor.u32 %v803_v56, %v706_v58  ;;  %v696_v60 = vld [vmem:[%s1146_s5] sm:$0xf]  ;;  %v802_v61 = vld [vmem:[%s1146_s5 + $0x4] sm:$0xf0] }
  0x1a   :  { %364 = vmatpush.bf16.msra.mxu0 %v705_v57  ;;  %v801_v62 = vld [vmem:[%s1146_s5 + $0x4] sm:$0xf]  ;;  %v697_v63 = vor.u32 %v802_v61, %v696_v60  ;;  %v698_v0 = vld [vmem:[%s1146_s5 + $0x8] sm:$0xf0]  ;;  %v812_v2 = vld [vmem:[%s1148_s7 + $0x38] sm:$0xff] }
  0x1b   :  { %138 = vmatpush.bf16.msra.mxu2 %v599_v22  ;;  %378 = vmatpush.bf16.msra.mxu1 %v709_v59  ;;  %v701_v1 = vor.u32 %v801_v62, %v698_v0  ;;  %v820_v3 = vld [vmem:[%s1148_s7 + $0x78] sm:$0xff]  ;;  %v833_v5 = vld [vmem:[%s1145_s4] ss:$0 sm:$0xff]  ;;  %v811_v16 = vld [vmem:[%s1148_s7 + $0x30] sm:$0xff] }
  0x1c   :  { %152 = vmatpush.bf16.msra.mxu3 %v603_v23  ;;  %v819_v17 = vld [vmem:[%s1148_s7 + $0x70] sm:$0xff]  ;;  %v810_v18 = vld [vmem:[%s1148_s7 + $0x28] sm:$0xff]  ;;  %v809_v20 = vld [vmem:[%s1148_s7 + $0x20] sm:$0xff] }
  0x1d   :  { %v818_v19 = vld [vmem:[%s1148_s7 + $0x68] sm:$0xff]  ;;  %v817_v21 = vld [vmem:[%s1148_s7 + $0x60] sm:$0xff]  ;;  %v808_v22 = vld [vmem:[%s1148_s7 + $0x18] sm:$0xff] }
  0x1e   :  { %628 = vmatmul.msk.bf16.vlgmr.msra.gmra.mxu2 %vm127_vm0, %v776_v26  ;;  %365 = vmatpush.bf16.msra.mxu0 %v697_v63  ;;  %v816_v23 = vld [vmem:[%s1148_s7 + $0x58] sm:$0xff] }
  0x1f   :  { %293 = vmatpush.bf16.msrb.mxu2 %v792_v24  ;;  %629 = vmatmul.msk.bf16.vlgmr.msra.gmra.mxu3 %vm127_vm0, %v776_v26  ;;  %v807_v24 = vld [vmem:[%s1148_s7 + $0x10] sm:$0xff]  ;;  %v806_v26 = vld [vmem:[%s1148_s7 + $0x8] sm:$0xff] }
  0x20   :  { %307 = vmatpush.bf16.msrb.mxu3 %v800_v25  ;;  %379 = vmatpush.bf16.msra.mxu1 %v701_v1  ;;  %v815_v25 = vld [vmem:[%s1148_s7 + $0x50] sm:$0xff] }
  0x22   :  { %540 = vmatpush.bf16.msrb.mxu0 %v812_v2 }
  0x23   :  { %294 = vmatpush.bf16.msrb.mxu2 %v791_v27  ;;  %v814_v27 = vld [vmem:[%s1148_s7 + $0x48] sm:$0xff] }
  0x24   :  { %308 = vmatpush.bf16.msrb.mxu3 %v799_v28  ;;  %554 = vmatpush.bf16.msrb.mxu1 %v820_v3  ;;  %v805_v28 = vld [vmem:[%s1148_s7] sm:$0xff] }
  0x26   :  { %541 = vmatpush.bf16.msrb.mxu0 %v811_v16 }
  0x27   :  { %295 = vmatpush.bf16.msrb.mxu2 %v790_v29  ;;  %v813_v29 = vld [vmem:[%s1148_s7 + $0x40] sm:$0xff] }
  0x28   :  { %309 = vmatpush.bf16.msrb.mxu3 %v798_v30  ;;  %555 = vmatpush.bf16.msrb.mxu1 %v819_v17  ;;  %v328_v30 = vld [vmem:[%s1147_s6] sm:$0x3] }
  0x2a   :  { %542 = vmatpush.bf16.msrb.mxu0 %v810_v18 }
  0x2b   :  { %296 = vmatpush.bf16.msrb.mxu2 %v789_v31  ;;  %v330_v31 = vperm.slane %v328_v30, 0 }
  0x2c   :  { %310 = vmatpush.bf16.msrb.mxu3 %v797_v32  ;;  %556 = vmatpush.bf16.msrb.mxu1 %v818_v19  ;;  %v331_v32 = vperm.slane %v328_v30, 1 }
  0x2e   :  { %543 = vmatpush.bf16.msrb.mxu0 %v809_v20 }
  0x2f   :  { %297 = vmatpush.bf16.msrb.mxu2 %v788_v33 }
  0x30   :  { %311 = vmatpush.bf16.msrb.mxu3 %v796_v34  ;;  %557 = vmatpush.bf16.msrb.mxu1 %v817_v21 }
  0x32   :  { %544 = vmatpush.bf16.msrb.mxu0 %v808_v22 }
  0x33   :  { %298 = vmatpush.bf16.msrb.mxu2 %v787_v35 }
  0x34   :  { %312 = vmatpush.bf16.msrb.mxu3 %v795_v36  ;;  %558 = vmatpush.bf16.msrb.mxu1 %v816_v23 }
  0x36   :  { %545 = vmatpush.bf16.msrb.mxu0 %v807_v24 }
  0x37   :  { %299 = vmatpush.bf16.msrb.mxu2 %v786_v37 }
  0x38   :  { %313 = vmatpush.bf16.msrb.mxu3 %v794_v38  ;;  %559 = vmatpush.bf16.msrb.mxu1 %v815_v25 }
  0x3a   :  { %546 = vmatpush.bf16.msrb.mxu0 %v806_v26 }
  0x3b   :  { %300 = vmatpush.bf16.msrb.mxu2 %v785_v39 }
  0x3c   :  { %314 = vmatpush.bf16.msrb.mxu3 %v793_v40  ;;  %560 = vmatpush.bf16.msrb.mxu1 %v814_v27 }
  0x3e   :  { %547 = vmatpush.bf16.msrb.mxu0 %v805_v28 }
  0x40   :  { %561 = vmatpush.bf16.msrb.mxu1 %v813_v29 }
  0xa1   :  { %v140_v41 = vpop.f32.mrf.mxu2 }
  0xa2   :  { %v154_v42 = vpop.f32.mrf.mxu3  ;;  %v1038_v47 = vadd.f32 %v140_v41, %v78_v44 }
  0xa3   :  { %v1042_v50 = vadd.f32 %v154_v42, %v79_v45 }
  0xa9   :  { %v142_v46 = vpop.f32.mrf.mxu2 }
  0xaa   :  { %v1040_v48 = vadd.f32 %v142_v46, %v78_v44  ;;  %v156_v49 = vpop.f32.mrf.mxu3 }
  0xab   :  { %v1044_v51 = vadd.f32 %v156_v49, %v79_v45 }
  0xac   :  { %v159_v52 = vpack.c.bf16 %v1040_v48, %v1038_v47 }
  0xad   :  { %v160_v53 = vpack.c.bf16 %v1044_v51, %v1042_v50 }
  0xae   :  { %301 = vmatmul.bf16.vlgmr.msrb.gmra.mxu2 %v159_v52 }
  0xaf   :  { %315 = vmatmul.bf16.vlgmr.msrb.gmra.mxu3 %v160_v53 }
 0x131   :  { %v302_v4 = vpop.f32.mrf.mxu2 }
 0x132   :  { %v316_v6 = vpop.f32.mrf.mxu3  ;;  %v303_v7 = vadd.f32 %v833_v5, %v302_v4 }
 0x134   :  { %v317_v9 = vadd.f32 %v316_v6, %v303_v7 }
 0x136   :  { %v321_v13 = vmax.f32 %v317_v9, 0.0 }
 0x139   :  { %v304_v8 = vpop.f32.mrf.mxu2 }
 0x13a   :  { %v305_v10 = vadd.f32 %v833_v5, %v304_v8  ;;  %v318_v11 = vpop.f32.mrf.mxu3  ;;  %v834_v5 = vld [vmem:[%s1149_s8] ss:$0 sm:$0xff] }
 0x13c   :  { %v319_v12 = vadd.f32 %v318_v11, %v305_v10 }
 0x13e   :  { %v322_v14 = vmax.f32 %v319_v12, 0.0 }
 0x140   :  { %v323_v15 = vpack.c.bf16 %v322_v14, %v321_v13 }
 0x142   :  { %710 = vmatmul.msk.bf16.vlgmr.msra.gmra.mxu0 %vm354_vm1, %v323_v15  ;;  %711 = vmatmul.msk.bf16.vlgmr.msra.gmra.mxu1 %vm354_vm1, %v323_v15 }
 0x1bf   :  { %v367_v33 = vpop.f32.mrf.mxu0  ;;  %v381_v34 = vpop.f32.mrf.mxu1 }
 0x1c0   :  { %v368_v35 = vadd.f32 %v367_v33, %v330_v31  ;;  %v382_v36 = vadd.f32 %v381_v34, %v331_v32 }
 0x1c2   :  { %v386_v37 = vmul.f32 0.5, %v368_v35  ;;  %v387_v38 = vmul.f32 0.5, %v382_v36 }
 0x1c4   :  { %835 = vtanh.f32 %v386_v37 }
 0x1c5   :  { %837 = vtanh.f32 %v387_v38 }
 0x1c7   :  { %v369_v39 = vpop.f32.mrf.mxu0  ;;  %v383_v40 = vpop.f32.mrf.mxu1 }
 0x1c8   :  { %v370_v41 = vadd.f32 %v369_v39, %v330_v31  ;;  %v384_v42 = vadd.f32 %v383_v40, %v331_v32 }
 0x1ca   :  { %v388_v43 = vmul.f32 0.5, %v370_v41  ;;  %v389_v44 = vmul.f32 0.5, %v384_v42  ;;  %v836_v45 = vpop.eup %835 }
 0x1cb   :  { %v838_v46 = vpop.eup %837  ;;  %v394_v49 = vmul.f32 0.5, %v836_v45 }
 0x1cc   :  { %839 = vtanh.f32 %v388_v43  ;;  %v395_v52 = vmul.f32 0.5, %v838_v46 }
 0x1cd   :  { %841 = vtanh.f32 %v389_v44  ;;  %v398_v55 = vadd.f32 0.5, %v394_v49 }
 0x1ce   :  { %v399_v57 = vadd.f32 0.5, %v395_v52 }
 0x1cf   :  { %v402_v61 = vmul.f32 %v398_v55, %v1038_v47 }
 0x1d0   :  { %v403_v63 = vmul.f32 %v399_v57, %v1042_v50 }
 0x1d2   :  { %v840_v53 = vpop.eup %839 }
 0x1d3   :  { %v842_v54 = vpop.eup %841  ;;  %v396_v56 = vmul.f32 0.5, %v840_v53 }
 0x1d4   :  { %v397_v58 = vmul.f32 0.5, %v842_v54 }
 0x1d5   :  { %v400_v59 = vadd.f32 0.5, %v396_v56 }
 0x1d6   :  { %v401_v60 = vadd.f32 0.5, %v397_v58 }
 0x1d7   :  { %v404_v62 = vmul.f32 %v400_v59, %v1040_v48 }
 0x1d8   :  { %v405_v0 = vmul.f32 %v401_v60, %v1044_v51 }
 0x1d9   :  { %v406_v1 = vpack.c.bf16 %v404_v62, %v402_v61 }
 0x1da   :  { %v407_v2 = vpack.c.bf16 %v405_v0, %v403_v63 }
 0x1db   :  { %548 = vmatmul.bf16.vlgmr.msrb.gmra.mxu0 %v406_v1 }
 0x1dc   :  { %562 = vmatmul.bf16.vlgmr.msrb.gmra.mxu1 %v407_v2 }
 0x258   :  { %v549_v3 = vpop.f32.mrf.mxu0 }
 0x259   :  { %v563_v4 = vpop.f32.mrf.mxu1  ;;  %v550_v6 = vadd.f32 %v834_v5, %v549_v3 }
 0x25b   :  { %v564_v48 = vadd.f32 %v563_v4, %v550_v6 }
 0x260   :  { %v551_v7 = vpop.f32.mrf.mxu0 }
 0x261   :  { %v552_v8 = vadd.f32 %v834_v5, %v551_v7  ;;  %v565_v47 = vpop.f32.mrf.mxu1 }
 0x263   :  { %v566_v50 = vadd.f32 %v565_v47, %v552_v8 }
 0x265   :  { %v824_v51 = vpack.c.bf16 %v566_v50, %v564_v48 }
 0x267   :  { %825 = vst [vmem:[#allocation7] sm:$0xff] %v824_v51  }
 0x268   :  { %584 = dma.vmem_to_hbm [thread:$0]  %s577_s14, 128, %s579_s19, [#allocation4], %s922_s17, %s922_s17, %s923_s18  }
 0x269   :  { %919 = dma.done.wait [#allocation4], 128  }
 0x26a   :  { %920 = vsyncadd [#allocation4], 4294967168 }
 0x26b   :  { %589 = vsyncpa [#allocation3], 1 }
 0x26c   :  { %590 = vsyncpa [#allocation6], 1 }
 0x26d   :  { %591 = vsyncpa [#allocation4], 1 }

</bundles_post_ra>
